<compile_context>
chip_gen: v7x
topology: tpu7x:2x2x1
jax: 0.10.0
libtpu: 0.0.40
codegen_flags: <defaults>
</compile_context>

<pallas_src>
import math

import jax
import jax.numpy as jnp
from jax import lax
from jax.experimental import pallas as pl
from jax.experimental.pallas import tpu as pltpu

_SQRT2 = math.sqrt(2.0)


def _gelu_exact(x):
    # nn.GELU default is the exact erf-based formulation.
    return 0.5 * x * (1.0 + lax.erf(x / _SQRT2))


def _softplus(x):
    # PyTorch-style softplus (threshold=20): log1p(exp(x)) with overflow guard.
    return jnp.where(x > 20.0, x, jnp.log1p(jnp.exp(jnp.minimum(x, 20.0))))


def vol_surface_head_kernel(x_ref, w1_ref, b1_ref, w2r_ref, b2_ref, o_ref):
    # x_ref:   (tm, D)  VMEM — row tile of flattened tokens (f32 or bf16)
    # w1_ref:  (D, H)   VMEM — resident across all grid steps
    # b1_ref:  (1, H)   VMEM — f32
    # w2r_ref: (1, H)   VMEM — second-layer weight stored as a row, f32
    # b2_ref:  (1,)     SMEM — scalar
    # o_ref:   (tm, 1)  VMEM — per-row scalar output column
    h = jnp.dot(x_ref[...], w1_ref[...], preferred_element_type=jnp.float32)
    h = _gelu_exact(h + b1_ref[...])
    # Second projection as VPU multiply + lane reduction: no (tm,H) transpose,
    # no (H,tm) copy of h, no degenerate N=1 MXU matmul.
    z = jnp.sum(h * w2r_ref[...], axis=-1, keepdims=True) + b2_ref[0]
    z = _softplus(z)   # Softplus inside self.net
    z = _softplus(z)   # F.softplus applied again in forward()
    o_ref[...] = z.astype(o_ref.dtype)


def _vmem_capacity_bytes():
    try:
        return int(pltpu.get_tpu_info().vmem_capacity_bytes)
    except Exception:
        return 64 << 20          # conservative default (v7x per-TensorCore VMEM)


def _vmem_need_bytes(tm, D, H, x_isz, single_buffer_weights):
    w_bufs = 1 if single_buffer_weights else 2
    return (2 * tm * D * x_isz                    # double-buffered x row tiles
            + 2 * tm * 128 * 4                    # double-buffered (tm,1) out tiles (lane-padded)
            + 2 * tm * H * 4                      # (tm,H) hidden activation + one temporary
            + w_bufs * D * H * x_isz              # W1 (resident)
            + 2 * 8 * max(H, 128) * 4)            # b1 / W2 row (tile-padded, tiny)


def vol_surface_head(x, w1, b1, w2, b2, *, tm=None, stream_dtype=None):
    """
    Args:
      x:  (B, HW, D) float32
      w1: (D, H), b1: (H,), w2: (H, 1), b2: (1,)
      tm: optional row-tile override.
      stream_dtype: optional (e.g. jnp.bfloat16) — stream x and W1 in this dtype
        (f32 MXU accumulation, f32 output).  Changes numerics; opt-in only.
    Returns:
      (B, HW) float32
    """
    B, HW, D = x.shape
    H = w1.shape[1]
    M = B * HW

    x2 = x.reshape(M, D)                          # free reshape, no copy / no pad
    if stream_dtype is not None:
        x2 = x2.astype(stream_dtype)
        w1 = w1.astype(stream_dtype)
    x_isz = jnp.dtype(x2.dtype).itemsize

    b1_row = b1.reshape(1, H).astype(jnp.float32)
    w2_row = w2.reshape(1, H).astype(jnp.float32)  # (H,1) column -> (1,H) row
    b2_vec = b2.reshape(1).astype(jnp.float32)

    vmem_cap = (3 * _vmem_capacity_bytes()) // 4   # ~48 MiB on v7x, ~96 MiB on v5e/v6e
    single_buf_w = (D * H * x_isz) > (1 << 20)     # only bother for big weights

    # ---- row-tile selection (no padding; last tile may be ragged) -----------
    if tm is None:
        if M <= 512:
            tm = M                                 # tiny problem: one grid step
        else:
            tm = 128
            for cand in (8192, 4096, 2048, 1024, 512, 256, 128):
                if int(_vmem_need_bytes(cand, D, H, x_isz, single_buf_w) * 1.4) <= vmem_cap:
                    tm = cand
                    break
            # Keep at least two grid steps so the v7x two-TensorCore split and
            # the DMA/compute pipeline have work to overlap.
            two_tile_tm = ((pl.cdiv(M, 2) + 127) // 128) * 128
            tm = min(tm, two_tile_tm)
    else:
        tm = min(int(tm), M)
    num_tiles = pl.cdiv(M, tm)

    need = _vmem_need_bytes(tm, D, H, x_isz, single_buf_w)
    vmem_limit = int(min(max(int(need * 1.4), 32 << 20), vmem_cap))

    # Resident-weight spec: single-buffer it only when it is big enough to matter.
    w1_kwargs = dict(pipeline_mode=pl.Buffered(1)) if single_buf_w else {}

    cost = pl.CostEstimate(
        flops=int(2 * M * D * H + 10 * M * H),
        transcendentals=int(M * H + 2 * M),
        bytes_accessed=int((M * D + D * H) * x_isz + (2 * H + 1) * 4 + M * 4),
    )

    out = pl.pallas_call(
        vol_surface_head_kernel,
        out_shape=jax.ShapeDtypeStruct((M, 1), jnp.float32),
        grid_spec=pl.GridSpec(
            grid=(num_tiles,),
            in_specs=[
                pl.BlockSpec((tm, D), lambda i: (i, 0)),              # x row tile
                pl.BlockSpec((D, H), lambda i: (0, 0), **w1_kwargs),  # W1 (resident)
                pl.BlockSpec((1, H), lambda i: (0, 0)),               # b1
                pl.BlockSpec((1, H), lambda i: (0, 0)),               # W2 row
                pl.BlockSpec(memory_space=pltpu.MemorySpace.SMEM),    # b2 scalar
            ],
            out_specs=pl.BlockSpec((tm, 1), lambda i: (i, 0)),        # per-row output
        ),
        compiler_params=pltpu.CompilerParams(
            dimension_semantics=("parallel",),
            vmem_limit_bytes=vmem_limit),
        cost_estimate=cost,
    )(x2, w1, b1_row, w2_row, b2_vec)

    return out.reshape(B, HW)


def _reference(x, w1, b1, w2, b2):
    h = x @ w1 + b1
    h = 0.5 * h * (1.0 + lax.erf(h / _SQRT2))
    z = h @ w2 + b2
    z = jax.nn.softplus(jax.nn.softplus(z))
    return z[..., 0]


def _make_inputs(key, B, HW, D, H):
    k_x, k_w1, k_b1, k_w2, k_b2 = jax.random.split(key, 5)
    # Deterministic PyTorch-style Linear init: U(-1/sqrt(fan_in), 1/sqrt(fan_in))
    lim1 = 1.0 / math.sqrt(D)
    lim2 = 1.0 / math.sqrt(H)
    x = jax.random.normal(k_x, (B, HW, D), dtype=jnp.float32)
    w1 = jax.random.uniform(k_w1, (D, H), jnp.float32, -lim1, lim1)
    b1 = jax.random.uniform(k_b1, (H,), jnp.float32, -lim1, lim1)
    w2 = jax.random.uniform(k_w2, (H, 1), jnp.float32, -lim2, lim2)
    b2 = jax.random.uniform(k_b2, (1,), jnp.float32, -lim2, lim2)
    return x, w1, b1, w2, b2


if __name__ == "__main__":
    key = jax.random.PRNGKey(0)
    k1, k2 = jax.random.split(key)

    # 1) Small single-tile path (grid=(1,)).
    x, w1, b1, w2, b2 = _make_inputs(k1, 2, 16, 32, 64)
    out = jax.block_until_ready(vol_surface_head(x, w1, b1, w2, b2))
    ref = _reference(x, w1, b1, w2, b2)
    assert out.shape == (2, 16), out.shape
    assert jnp.allclose(out, ref, atol=2e-5, rtol=2e-5), \
        f"max err {float(jnp.max(jnp.abs(out - ref)))}"

    # 2) Gridded path with a ragged last tile (M=600 -> tm=384, 2 tiles), no pad copy.
    x, w1, b1, w2, b2 = _make_inputs(k2, 2, 300, 32, 64)
    out = jax.block_until_ready(vol_surface_head(x, w1, b1, w2, b2))
    ref = _reference(x, w1, b1, w2, b2)
    assert out.shape == (2, 300), out.shape
    assert jnp.allclose(out, ref, atol=2e-5, rtol=2e-5), \
        f"max err {float(jnp.max(jnp.abs(out - ref)))}"

    # 3) Opt-in bf16 streaming of x / W1 (halves HBM read traffic), looser tolerance.
    x, w1, b1, w2, b2 = _make_inputs(k1, 2, 16, 32, 64)
    out_bf = jax.block_until_ready(
        vol_surface_head(x, w1, b1, w2, b2, stream_dtype=jnp.bfloat16))
    ref = _reference(x, w1, b1, w2, b2)
    assert jnp.allclose(out_bf, ref, atol=3e-2, rtol=3e-2), \
        f"max err {float(jnp.max(jnp.abs(out_bf - ref)))}"

    print("KERNEL_OK")
</pallas_src>

<mosaic_0001>
module attributes {stable_mosaic.version = 11 : i64} {
  func.func @vol_surface_head_kernel(%arg0: i32, %arg1: memref<32x32xf32, #tpu.memory_space<vmem>>, %arg2: memref<32x64xf32, #tpu.memory_space<vmem>>, %arg3: memref<1x64xf32, #tpu.memory_space<vmem>>, %arg4: memref<1x64xf32, #tpu.memory_space<vmem>>, %arg5: memref<1xf32, #tpu.memory_space<smem>>, %arg6: memref<32x1xf32, #tpu.memory_space<vmem>>) attributes {dimension_semantics = [#tpu.dimension_semantics<parallel>], iteration_bounds = array<i64: 1>, scalar_prefetch = 0 : i64, scratch_operands = 0 : i64, tpu.core_type = #tpu.core_type<tc>, window_params = [{transform_indices = @transform_0, window_bounds = array<i64: 32, 32>}, {pipeline_mode = #tpu.pipeline_mode<synchronous>, transform_indices = @transform_1, window_bounds = array<i64: 32, 64>}, {pipeline_mode = #tpu.pipeline_mode<synchronous>, transform_indices = @transform_2, window_bounds = array<i64: 1, 64>}, {pipeline_mode = #tpu.pipeline_mode<synchronous>, transform_indices = @transform_3, window_bounds = array<i64: 1, 64>}, {transform_indices = @transform_4, window_bounds = array<i64: 1>}, {transform_indices = @transform_5, window_bounds = array<i64: 32, 1>}]} {
    %c0 = arith.constant 0 : index
    %c0_0 = arith.constant 0 : index
    %0 = vector.load %arg1[%c0, %c0_0] : memref<32x32xf32, #tpu.memory_space<vmem>>, vector<32x32xf32>
    %c0_1 = arith.constant 0 : index
    %c0_2 = arith.constant 0 : index
    %1 = vector.load %arg2[%c0_1, %c0_2] : memref<32x64xf32, #tpu.memory_space<vmem>>, vector<32x64xf32>
    %cst = arith.constant dense<0.000000e+00> : vector<32x64xf32>
    %2 = tpu.matmul %0, %1, %cst {dimension_numbers = #tpu.dot_dimension_numbers<[1], [0], [0], [1], [0, 0, 1, 1], [], []>} : vector<32x32xf32>, vector<32x64xf32>, vector<32x64xf32> -> vector<32x64xf32>
    %c0_3 = arith.constant 0 : index
    %c0_4 = arith.constant 0 : index
    %3 = vector.load %arg3[%c0_3, %c0_4] : memref<1x64xf32, #tpu.memory_space<vmem>>, vector<1x64xf32>
    %4 = vector.broadcast %3 : vector<1x64xf32> to vector<32x64xf32>
    %5 = arith.addf %2, %4 : vector<32x64xf32>
    %cst_5 = arith.constant 5.000000e-01 : f32
    %6 = vector.broadcast %cst_5 : f32 to vector<32x64xf32>
    %7 = arith.mulf %6, %5 : vector<32x64xf32>
    %cst_6 = arith.constant 1.41421354 : f32
    %8 = vector.broadcast %cst_6 : f32 to vector<32x64xf32>
    %9 = arith.divf %5, %8 : vector<32x64xf32>
    %10 = math.erf %9 : vector<32x64xf32>
    %cst_7 = arith.constant 1.000000e+00 : f32
    %11 = vector.broadcast %cst_7 : f32 to vector<32x64xf32>
    %12 = arith.addf %11, %10 : vector<32x64xf32>
    %13 = arith.mulf %7, %12 : vector<32x64xf32>
    %c0_8 = arith.constant 0 : index
    %c0_9 = arith.constant 0 : index
    %14 = vector.load %arg4[%c0_8, %c0_9] : memref<1x64xf32, #tpu.memory_space<vmem>>, vector<1x64xf32>
    %15 = vector.broadcast %14 : vector<1x64xf32> to vector<32x64xf32>
    %16 = arith.mulf %13, %15 : vector<32x64xf32>
    %cst_10 = arith.constant dense<0.000000e+00> : vector<32xf32>
    %17 = vector.multi_reduction <add>, %16, %cst_10 [1] : vector<32x64xf32> to vector<32xf32>
    %18 = vector.shape_cast %17 : vector<32xf32> to vector<32x1xf32>
    %c0_11 = arith.constant 0 : index
    %19 = memref.load %arg5[%c0_11] : memref<1xf32, #tpu.memory_space<smem>>
    %20 = vector.broadcast %19 : f32 to vector<32x1xf32>
    %21 = arith.addf %18, %20 : vector<32x1xf32>
    %cst_12 = arith.constant 2.000000e+01 : f32
    %22 = vector.broadcast %cst_12 : f32 to vector<32x1xf32>
    %23 = arith.cmpf ogt, %21, %22 : vector<32x1xf32>
    %cst_13 = arith.constant 2.000000e+01 : f32
    %24 = vector.broadcast %cst_13 : f32 to vector<32x1xf32>
    %25 = arith.minimumf %21, %24 : vector<32x1xf32>
    %26 = math.exp %25 : vector<32x1xf32>
    %27 = math.log1p %26 : vector<32x1xf32>
    %28 = arith.select %23, %21, %27 : vector<32x1xi1>, vector<32x1xf32>
    %cst_14 = arith.constant 2.000000e+01 : f32
    %29 = vector.broadcast %cst_14 : f32 to vector<32x1xf32>
    %30 = arith.cmpf ogt, %28, %29 : vector<32x1xf32>
    %cst_15 = arith.constant 2.000000e+01 : f32
    %31 = vector.broadcast %cst_15 : f32 to vector<32x1xf32>
    %32 = arith.minimumf %28, %31 : vector<32x1xf32>
    %33 = math.exp %32 : vector<32x1xf32>
    %34 = math.log1p %33 : vector<32x1xf32>
    %35 = arith.select %30, %28, %34 : vector<32x1xi1>, vector<32x1xf32>
    %c0_16 = arith.constant 0 : index
    %c0_17 = arith.constant 0 : index
    %36 = vector.load %arg6[%c0_16, %c0_17] : memref<32x1xf32, #tpu.memory_space<vmem>>, vector<32x1xf32>
    tpu.vector_store %arg6[%c0_16, %c0_17], %35 {strides = array<i32>} : memref<32x1xf32, #tpu.memory_space<vmem>>, vector<32x1xf32>,
    return
  }
  func.func @transform_0(%arg0: i32) -> (i32, i32) {
    %c0_i32 = arith.constant 0 : i32
    %c0_i32_0 = arith.constant 0 : i32
    return %arg0, %c0_i32 : i32, i32
  }
  func.func @transform_1(%arg0: i32) -> (i32, i32) {
    %c0_i32 = arith.constant 0 : i32
    %c0_i32_0 = arith.constant 0 : i32
    %c0_i32_1 = arith.constant 0 : i32
    return %c0_i32, %c0_i32_0 : i32, i32
  }
  func.func @transform_2(%arg0: i32) -> (i32, i32) {
    %c0_i32 = arith.constant 0 : i32
    %c0_i32_0 = arith.constant 0 : i32
    %c0_i32_1 = arith.constant 0 : i32
    return %c0_i32, %c0_i32_0 : i32, i32
  }
  func.func @transform_3(%arg0: i32) -> (i32, i32) {
    %c0_i32 = arith.constant 0 : i32
    %c0_i32_0 = arith.constant 0 : i32
    %c0_i32_1 = arith.constant 0 : i32
    return %c0_i32, %c0_i32_0 : i32, i32
  }
  func.func @transform_4(%arg0: i32) -> i32 {
    %c0_i32 = arith.constant 0 : i32
    %c0_i32_0 = arith.constant 0 : i32
    return %c0_i32 : i32
  }
  func.func @transform_5(%arg0: i32) -> (i32, i32) {
    %c0_i32 = arith.constant 0 : i32
    %c0_i32_0 = arith.constant 0 : i32
    return %arg0, %c0_i32 : i32, i32
  }
}

</mosaic_0001>

<bundles_post_ra>
// kernel: tpu_custom_call.1
= control target key start
LH: loop header
LB: loop body
LE: loop exit
PB: predicated region body
PF: predicated region fallthrough
CT: control target
= control target key end

     0   :  { %11 = vsyncpa [#allocation4], 0  ;;  %s585_s0 = inlined_call_operand.hbm [shape: f32[32,32], index: 0, kind: input, shape index: {}]   ;;  %s586_s1 = inlined_call_operand.hbm [shape: f32[32,64], index: 1, kind: input, shape index: {}]   ;;  %s587_s2 = inlined_call_operand.vmem [shape: f32[1,64], index: 2, kind: input, shape index: {}]   ;;  %s588_s3 = inlined_call_operand.vmem [shape: f32[1,64], index: 3, kind: input, shape index: {}]   ;;  %s589_s4 = inlined_call_operand.<no memory space> [shape: f32[1], index: 4, kind: input, shape index: {}]   ;;  %s590_s5 = inlined_call_operand.vmem [shape: f32[32,1], index: 5, kind: output, shape index: {}]  }
   0x1   :  { %12 = vsyncpa [#allocation6], 0  ;;  %s468_s18 = smov [#allocation3]   ;;  %s420_s22 = scalar_lea.hbm %s585_s0, 512 }
   0x2   :  { %s18_s19 = sshll.u32 %s468_s18, 4  ;;  %p421_p0 = scmp.ne.s32.totalorder %s585_s0, %s420_s22  ;;  %s19_s19 = int_to_ptr.vmem [resolvable:$true] %s18_s19 }
   0x3   :  { %p424_p1 = scmp.lt.u32.totalorder %s420_s22, %s585_s0 }
   0x5   :  { %p426_p2 = pnand %p424_p1, %p421_p0 }
   0x7   :  { %429 = shalt.err (!%p426_p2)
}
   0x8   :  { %s430_s27 = scalar_lea.vmem %s19_s19, 512  ;;  %p435_p4 = scmp.lt.s32.totalorder %s19_s19, %s19_s19 }
   0x9   :  { %p431_p3 = scmp.ne.s32.totalorder %s19_s19, %s430_s27  ;;  %p436_p5 = scmp.lt.s32.totalorder %s430_s27, %s430_s27 }
   0xb   :  { %p437_p6 = por %p436_p5, %p435_p4 }
   0xd   :  { %p438_p7 = pnand %p437_p6, %p431_p3 }
   0xf   :  { %441 = shalt.err (!%p438_p7)
}
  0x10   :  { %s469_s28 = smov 128   ;;  %s470_s29 = smov 8  }
  0x11   :  { %24 = dma.hbm_to_vmem [thread:$0]  %s585_s0, 512, %s19_s19, [#allocation4], %s469_s28, %s469_s28, %s470_s29  }
  0x12   :  { %s471_s7 = smov [#allocation5]   ;;  %s442_s11 = scalar_lea.hbm %s586_s1, 512 }
  0x13   :  { %s30_s8 = sshll.u32 %s471_s7, 4  ;;  %p443_p8 = scmp.ne.s32.totalorder %s586_s1, %s442_s11  ;;  %s31_s8 = int_to_ptr.vmem [resolvable:$true] %s30_s8 }
  0x14   :  { %p446_p9 = scmp.lt.u32.totalorder %s442_s11, %s586_s1 }
  0x16   :  { %p448_p10 = pnand %p446_p9, %p443_p8 }
  0x18   :  { %451 = shalt.err (!%p448_p10)
}
  0x19   :  { %s452_s16 = scalar_lea.vmem %s31_s8, 512  ;;  %p457_p12 = scmp.lt.s32.totalorder %s31_s8, %s31_s8 }
  0x1a   :  { %p453_p11 = scmp.ne.s32.totalorder %s31_s8, %s452_s16  ;;  %p458_p13 = scmp.lt.s32.totalorder %s452_s16, %s452_s16 }
  0x1c   :  { %p459_p0 = por %p458_p13, %p457_p12 }
  0x1e   :  { %p460_p1 = pnand %p459_p0, %p453_p11 }
  0x20   :  { %463 = shalt.err (!%p460_p1)
}
  0x21   :  { %36 = dma.hbm_to_vmem [thread:$0]  %s586_s1, 512, %s31_s8, [#allocation6], %s469_s28, %s469_s28, %s470_s29  }
  0x22   :  { %464 = dma.done.wait [#allocation4], 512  }
  0x23   :  { %465 = vsyncadd [#allocation4], 4294966784 }
  0x24   :  { %466 = dma.done.wait [#allocation6], 512  }
  0x25   :  { %467 = vsyncadd [#allocation6], 4294966784  ;;  %vm64_vm0 = vcmask 261120   ;;  %v53_v0 = vld [vmem:[#allocation5] sm:$0xff]  ;;  %v54_v1 = vld [vmem:[#allocation5 + $0x8] sm:$0xff]  ;;  %vm194_vm1 = vcmask 523264   ;;  %v208_v48 = vstv %s589_s4 }
  0x26   :  { %v55_v2 = vld [vmem:[#allocation5 + $0x10] sm:$0xff]  ;;  %v364_v3 = vpack.c.bf16 %v54_v1, %v53_v0  ;;  %v56_v4 = vld [vmem:[#allocation5 + $0x18] sm:$0xff]  ;;  %v49_v5 = vld [vmem:[#allocation3] sm:$0xff]  ;;  %vm325_vm10 = vcmask 7168  }
  0x27   :  { %v51_v6 = vld [vmem:[#allocation3 + $0x10] sm:$0xff]  ;;  %v368_v7 = vpack.c.bf16 %v56_v4, %v55_v2  ;;  %358 = vmatprep.mubr.msk.f32.mxu0 %vm64_vm0, %v49_v5  ;;  %v50_v8 = vld [vmem:[#allocation3 + $0x8] sm:$0xff]  ;;  %v52_v9 = vld [vmem:[#allocation3 + $0x18] sm:$0xff] }
  0x28   :  { %361 = vmatprep.mubr.msk.f32.mxu1 %vm64_vm0, %v51_v6  ;;  %365 = vmatprep.subr.bf16.mxu0 %v364_v3  ;;  %v336_v10 = vld [vmem:[%s587_s2] ss:$0 sm:$0xff] }
  0x29   :  { %372 = vmatprep.subr.bf16.mxu1 %v364_v3  ;;  %367 = vmatpush3.bf16.msra.mxu0 %v364_v3  ;;  %v341_v35 = vld [vmem:[%s588_s3] ss:$0 sm:$0xff] }
  0x2a   :  { %374 = vmatpush3.bf16.msra.mxu1 %v364_v3  ;;  %369 = vmatprep.subr.bf16.mxu0 %v368_v7 }
  0x2b   :  { %373 = vmatprep.subr.bf16.mxu1 %v368_v7 }
  0x2d   :  { %371 = vmatpush3.bf16.msra.mxu0 %v368_v7 }
  0x2e   :  { %375 = vmatpush3.bf16.msra.mxu1 %v368_v7 }
  0x30   :  { %359 = vmatmul.mubr.msk.f32.vlgmr.msra.gmra.mrb[0].mxu0 %vm64_vm0, %v50_v8 }
  0x31   :  { %362 = vmatmul.mubr.msk.f32.vlgmr.msra.gmra.mrb[0].mxu1 %vm64_vm0, %v52_v9 }
 0x103   :  { %v360_v11 = vpop.f32.mrb[0].mxu0 }
 0x104   :  { %v363_v12 = vpop.f32.mrb[0].mxu1  ;;  %v149_v13 = vadd.f32 %v360_v11, %v336_v10  ;;  %v143_v15 = vpop.f32.mrb[1].mxu0 }
 0x105   :  { %v159_v14 = vadd.f32 %v363_v12, %v336_v10  ;;  %v153_v16 = vpop.f32.mrb[1].mxu1  ;;  %v144_v17 = vadd.f32 %v336_v10, %v143_v15 }
 0x106   :  { %v154_v18 = vadd.f32 %v336_v10, %v153_v16  ;;  %v168_v19 = vmul.f32 0.70710677, %v149_v13  ;;  %v163_v29 = vmul.f32 0.5, %v149_v13 }
 0x107   :  { %v170_v20 = vmul.f32 0.70710677, %v159_v14  ;;  %v167_v21 = vmul.f32 0.70710677, %v144_v17  ;;  %v162_v30 = vmul.f32 0.5, %v144_v17  ;;  %v165_v32 = vmul.f32 0.5, %v159_v14 }
 0x108   :  { %v169_v22 = vmul.f32 0.70710677, %v154_v18  ;;  %380 = verf.f32 %v168_v19  ;;  %v164_v33 = vmul.f32 0.5, %v154_v18 }
 0x109   :  { %382 = verf.f32 %v170_v20 }
 0x10a   :  { %384 = verf.f32 %v167_v21 }
 0x10b   :  { %386 = verf.f32 %v169_v22 }
 0x112   :  { %v381_v23 = vpop.eup %380 }
 0x113   :  { %v383_v24 = vpop.eup %382  ;;  %v176_v25 = vadd.f32 1.0, %v381_v23 }
 0x114   :  { %v385_v26 = vpop.eup %384  ;;  %v178_v27 = vadd.f32 1.0, %v383_v24 }
 0x115   :  { %v387_v28 = vpop.eup %386  ;;  %v175_v31 = vadd.f32 1.0, %v385_v26  ;;  %v180_v37 = vmul.f32 %v176_v25, %v163_v29 }
 0x116   :  { %v177_v34 = vadd.f32 1.0, %v387_v28  ;;  %v182_v39 = vmul.f32 %v178_v27, %v165_v32 }
 0x117   :  { %v179_v36 = vmul.f32 %v175_v31, %v162_v30  ;;  %v191_v43 = vmul.f32 %v341_v35, %v180_v37 }
 0x118   :  { %v181_v38 = vmul.f32 %v177_v34, %v164_v33  ;;  %v193_v45 = vmul.f32 %v341_v35, %v182_v39 }
 0x119   :  { %v190_v40 = vmul.f32 %v341_v35, %v179_v36  ;;  %v198_v46 = vsel %vm194_vm1, %v191_v43, 0.0 }
 0x11a   :  { %v192_v41 = vmul.f32 %v341_v35, %v181_v38  ;;  %v204_v47 = vsel %vm194_vm1, %v193_v45, 0.0 }
 0x11b   :  { %v195_v42 = vsel %vm194_vm1, %v190_v40, 0.0 }
 0x11c   :  { %v201_v44 = vsel %vm194_vm1, %v192_v41, 0.0  ;;  %196 = vadd.xlane.f32.xlu0 %v195_v42 }
 0x11d   :  { %202 = vadd.xlane.f32.xlu1 %v201_v44 }
 0x120   :  { %199 = vadd.xlane.f32.xlu0 %v198_v46 }
 0x121   :  { %205 = vadd.xlane.f32.xlu1 %v204_v47 }
 0x1a9   :  { %v197_v49 = vpop.xlane.xlu0 %196 }
 0x1aa   :  { %v203_v50 = vpop.xlane.xlu1 %202  ;;  %v209_v51 = vadd.f32 %v208_v48, %v197_v49 }
 0x1ab   :  { %v211_v52 = vadd.f32 %v208_v48, %v203_v50 }
 0x1ac   :  { %v217_v53 = vmin.f32 %v209_v51, 20.0  ;;  %vm213_vm4 = vcmp.gt.f32.partialorder %v209_v51, 20.0 }
 0x1ad   :  { %v219_v54 = vmin.f32 %v211_v52, 20.0  ;;  %v200_v55 = vpop.xlane.xlu0 %199  ;;  %vm215_vm5 = vcmp.gt.f32.partialorder %v211_v52, 20.0 }
 0x1ae   :  { %v221_v56 = vmul.f32 1.442695, %v217_v53  ;;  %v206_v57 = vpop.xlane.xlu1 %205  ;;  %v539_v58 = vadd.f32 %v208_v48, %v200_v55 }
 0x1af   :  { %v225_v59 = vmul.f32 1.442695, %v219_v54  ;;  %v541_v60 = vadd.f32 %v208_v48, %v206_v57 }
 0x1b0   :  { %388 = vpow2.f32 %v221_v56  ;;  %v218_v61 = vmin.f32 %v539_v58, 20.0  ;;  %vm214_vm8 = vcmp.gt.f32.partialorder %v539_v58, 20.0 }
 0x1b1   :  { %390 = vpow2.f32 %v225_v59  ;;  %v220_v62 = vmin.f32 %v541_v60, 20.0  ;;  %vm216_vm9 = vcmp.gt.f32.partialorder %v541_v60, 20.0 }
 0x1b2   :  { %v223_v63 = vmul.f32 1.442695, %v218_v61 }
 0x1b3   :  { %v227_v0 = vmul.f32 1.442695, %v220_v62 }
 0x1b4   :  { %392 = vpow2.f32 %v223_v63 }
 0x1b5   :  { %394 = vpow2.f32 %v227_v0 }
 0x1ba   :  { %v389_v1 = vpop.eup %388 }
 0x1bb   :  { %v391_v2 = vpop.eup %390  ;;  %v229_v3 = vadd.f32 1.0, %v389_v1  ;;  %v232_v8 = vmul.f32 -0.5, %v389_v1  ;;  %v235_v12 = vand.u32 2147483647, %v389_v1 }
 0x1bc   :  { %v247_v4 = vadd.f32 1.0, %v391_v2  ;;  %v250_v10 = vmul.f32 -0.5, %v391_v2  ;;  %v253_v16 = vand.u32 2147483647, %v391_v2 }
 0x1bd   :  { %396 = vlog2.f32 %v229_v3  ;;  %v233_v11 = vadd.f32 1.0, %v232_v8  ;;  %vm236_vm2 = vcmp.lt.f32.partialorder %v235_v12, 0.0004427343 }
 0x1be   :  { %v393_v5 = vpop.eup %392  ;;  %398 = vlog2.f32 %v247_v4  ;;  %v251_v14 = vadd.f32 1.0, %v250_v10  ;;  %vm254_vm3 = vcmp.lt.f32.partialorder %v253_v16, 0.0004427343 }
 0x1bf   :  { %v395_v6 = vpop.eup %394  ;;  %v238_v7 = vadd.f32 1.0, %v393_v5  ;;  %v241_v13 = vmul.f32 -0.5, %v393_v5  ;;  %v234_v20 = vmul.f32 %v389_v1, %v233_v11  ;;  %v244_v25 = vand.u32 2147483647, %v393_v5 }
 0x1c0   :  { %v256_v9 = vadd.f32 1.0, %v395_v6  ;;  %v259_v15 = vmul.f32 -0.5, %v395_v6  ;;  %v252_v23 = vmul.f32 %v391_v2, %v251_v14  ;;  %v262_v27 = vand.u32 2147483647, %v395_v6 }
 0x1c1   :  { %400 = vlog2.f32 %v238_v7  ;;  %v242_v21 = vadd.f32 1.0, %v241_v13  ;;  %vm245_vm6 = vcmp.lt.f32.partialorder %v244_v25, 0.0004427343 }
 0x1c2   :  { %402 = vlog2.f32 %v256_v9  ;;  %v260_v24 = vadd.f32 1.0, %v259_v15  ;;  %vm263_vm7 = vcmp.lt.f32.partialorder %v262_v27, 0.0004427343 }
 0x1c3   :  { %v243_v35 = vmul.f32 %v393_v5, %v242_v21 }
 0x1c4   :  { %v261_v38 = vmul.f32 %v395_v6, %v260_v24 }
 0x1c7   :  { %v397_v17 = vpop.eup %396 }
 0x1c8   :  { %v399_v18 = vpop.eup %398  ;;  %v231_v19 = vmul.f32 0.6931472, %v397_v17 }
 0x1c9   :  { %v249_v22 = vmul.f32 0.6931472, %v399_v18 }
 0x1ca   :  { %v237_v26 = vsel %vm236_vm2, %v234_v20, %v231_v19 }
 0x1cb   :  { %v401_v28 = vpop.eup %400  ;;  %v255_v29 = vsel %vm254_vm3, %v252_v23, %v249_v22  ;;  %v545_v30 = vsel %vm213_vm4, %v209_v51, %v237_v26 }
 0x1cc   :  { %v403_v31 = vpop.eup %402  ;;  %v547_v32 = vsel %vm215_vm5, %v211_v52, %v255_v29  ;;  %v273_v33 = vmin.f32 %v545_v30, 20.0  ;;  %v240_v34 = vmul.f32 0.6931472, %v401_v28  ;;  %vm269_vm13 = vcmp.gt.f32.partialorder %v545_v30, 20.0 }
 0x1cd   :  { %v275_v36 = vmin.f32 %v547_v32, 20.0  ;;  %v258_v37 = vmul.f32 0.6931472, %v403_v31  ;;  %vm271_vm14 = vcmp.gt.f32.partialorder %v547_v32, 20.0 }
 0x1ce   :  { %v277_v39 = vmul.f32 1.442695, %v273_v33  ;;  %v246_v40 = vsel %vm245_vm6, %v243_v35, %v240_v34 }
 0x1cf   :  { %v281_v41 = vmul.f32 1.442695, %v275_v36  ;;  %v264_v42 = vsel %vm263_vm7, %v261_v38, %v258_v37  ;;  %v554_v43 = vsel %vm214_vm8, %v539_v58, %v246_v40 }
 0x1d0   :  { %404 = vpow2.f32 %v277_v39  ;;  %v557_v44 = vsel %vm216_vm9, %v541_v60, %v264_v42  ;;  %v274_v45 = vmin.f32 %v554_v43, 20.0  ;;  %vm270_vm1 = vcmp.gt.f32.partialorder %v554_v43, 20.0 }
 0x1d1   :  { %406 = vpow2.f32 %v281_v41  ;;  %v276_v46 = vmin.f32 %v557_v44, 20.0  ;;  %vm272_vm2 = vcmp.gt.f32.partialorder %v557_v44, 20.0 }
 0x1d2   :  { %v279_v47 = vmul.f32 1.442695, %v274_v45 }
 0x1d3   :  { %v283_v48 = vmul.f32 1.442695, %v276_v46 }
 0x1d4   :  { %408 = vpow2.f32 %v279_v47 }
 0x1d5   :  { %410 = vpow2.f32 %v283_v48 }
 0x1da   :  { %v405_v49 = vpop.eup %404 }
 0x1db   :  { %v407_v50 = vpop.eup %406  ;;  %v285_v51 = vadd.f32 1.0, %v405_v49  ;;  %v288_v56 = vmul.f32 -0.5, %v405_v49  ;;  %v291_v60 = vand.u32 2147483647, %v405_v49 }
 0x1dc   :  { %v303_v52 = vadd.f32 1.0, %v407_v50  ;;  %v306_v58 = vmul.f32 -0.5, %v407_v50  ;;  %v309_v0 = vand.u32 2147483647, %v407_v50 }
 0x1dd   :  { %412 = vlog2.f32 %v285_v51  ;;  %v289_v59 = vadd.f32 1.0, %v288_v56  ;;  %vm292_vm11 = vcmp.lt.f32.partialorder %v291_v60, 0.0004427343 }
 0x1de   :  { %v409_v53 = vpop.eup %408  ;;  %414 = vlog2.f32 %v303_v52  ;;  %v307_v62 = vadd.f32 1.0, %v306_v58  ;;  %vm310_vm12 = vcmp.lt.f32.partialorder %v309_v0, 0.0004427343 }
 0x1df   :  { %v411_v54 = vpop.eup %410  ;;  %v294_v55 = vadd.f32 1.0, %v409_v53  ;;  %v297_v61 = vmul.f32 -0.5, %v409_v53  ;;  %v290_v4 = vmul.f32 %v405_v49, %v289_v59  ;;  %v300_v9 = vand.u32 2147483647, %v409_v53 }
 0x1e0   :  { %v312_v57 = vadd.f32 1.0, %v411_v54  ;;  %v315_v63 = vmul.f32 -0.5, %v411_v54  ;;  %v308_v7 = vmul.f32 %v407_v50, %v307_v62  ;;  %v318_v11 = vand.u32 2147483647, %v411_v54 }
 0x1e1   :  { %416 = vlog2.f32 %v294_v55  ;;  %v298_v5 = vadd.f32 1.0, %v297_v61  ;;  %vm301_vm15 = vcmp.lt.f32.partialorder %v300_v9, 0.0004427343 }
 0x1e2   :  { %418 = vlog2.f32 %v312_v57  ;;  %v316_v8 = vadd.f32 1.0, %v315_v63  ;;  %vm319_vm0 = vcmp.lt.f32.partialorder %v318_v11, 0.0004427343 }
 0x1e3   :  { %v299_v18 = vmul.f32 %v409_v53, %v298_v5 }
 0x1e4   :  { %v317_v20 = vmul.f32 %v411_v54, %v316_v8 }
 0x1e7   :  { %v413_v1 = vpop.eup %412 }
 0x1e8   :  { %v415_v2 = vpop.eup %414  ;;  %v287_v3 = vmul.f32 0.6931472, %v413_v1 }
 0x1e9   :  { %v305_v6 = vmul.f32 0.6931472, %v415_v2 }
 0x1ea   :  { %v293_v10 = vsel %vm292_vm11, %v290_v4, %v287_v3 }
 0x1eb   :  { %v417_v12 = vpop.eup %416  ;;  %v311_v13 = vsel %vm310_vm12, %v308_v7, %v305_v6  ;;  %v321_v14 = vsel %vm269_vm13, %v545_v30, %v293_v10 }
 0x1ec   :  { %v419_v15 = vpop.eup %418  ;;  %v323_v16 = vsel %vm271_vm14, %v547_v32, %v311_v13  ;;  %326 = vst.msk [vmem:[%s590_s5] sm:$0xff] %vm325_vm10, %v321_v14  ;;  %v296_v17 = vmul.f32 0.6931472, %v417_v12 }
 0x1ed   :  { %328 = vst.msk [vmem:[%s590_s5 + $0x10] sm:$0xff] %vm325_vm10, %v323_v16  ;;  %v314_v19 = vmul.f32 0.6931472, %v419_v15 }
 0x1ee   :  { %v302_v21 = vsel %vm301_vm15, %v299_v18, %v296_v17 }
 0x1ef   :  { %v320_v22 = vsel %vm319_vm0, %v317_v20, %v314_v19  ;;  %v322_v23 = vsel %vm270_vm1, %v554_v43, %v302_v21 }
 0x1f0   :  { %v324_v24 = vsel %vm272_vm2, %v557_v44, %v320_v22  ;;  %327 = vst.msk [vmem:[%s590_s5 + $0x8] sm:$0xff] %vm325_vm10, %v322_v23 }
 0x1f1   :  { %329 = vst.msk [vmem:[%s590_s5 + $0x18] sm:$0xff] %vm325_vm10, %v324_v24 }
 0x1f2   :  { %334 = vsyncpa [#allocation4], 1 }
 0x1f3   :  { %335 = vsyncpa [#allocation6], 1 }

</bundles_post_ra>
